<compile_context>
chip_gen: v7x
topology: tpu7x:2x2x1
jax: 0.10.0
libtpu: 0.0.40
codegen_flags: <defaults>
</compile_context>

<pallas_src>
import functools

import jax
import jax.numpy as jnp
from jax import lax
from jax.experimental import pallas as pl
from jax.experimental.pallas import tpu as pltpu


_SINGLE_HW_MAX = 8192          # whole-H*W-in-one-block cutoff (elements)
_TARGET_BLOCK_BYTES = 4 << 20  # ~4 MiB/input block -> 8 MiB double-buffered (< v5e limit)
_STATIC_UNROLL_MAX = 32        # static python unroll up to this many 128-wide slabs
_FORI_UNROLL = 4               # partial unroll for the fori_loop slab loop


def _finalize(sum_vec, sq_vec, max_vec, min_vec, hw, out_dtype):
    """sum/sq/max/min are (R, 1) f32 -> (R, 4) = [mean | std | max | min]."""
    inv_n = 1.0 / hw
    # torch.std default is unbiased (n-1); NaN when H*W == 1, matching torch.
    inv_nm1 = 1.0 / (hw - 1) if hw > 1 else float("nan")
    mean = sum_vec * inv_n
    # Single-pass variance; clamp tiny negatives from f32 cancellation.
    var = jnp.maximum((sq_vec - sum_vec * mean) * inv_nm1, 0.0)
    std = jnp.sqrt(var)
    return jnp.concatenate([mean, std, max_vec, min_vec], axis=-1).astype(out_dtype)


def _accum_slabs(load_slab, n_slabs, init):
    """Accumulate lane-resident (R,128) sum / sumsq / max / min over n_slabs slabs."""
    def body(j, carry):
        s, ss, mx, mn = carry
        xz, xlo, xhi = load_slab(j)
        return (s + xz, ss + xz * xz,
                jnp.maximum(mx, xlo), jnp.minimum(mn, xhi))

    if n_slabs <= _STATIC_UNROLL_MAX:
        carry = init
        for j in range(n_slabs):          # static unroll (small chunks)
            carry = body(j, carry)
        return carry
    # Large chunks: partial unroll keeps scheduler visibility w/o code-size blowup.
    return lax.fori_loop(0, n_slabs, body, init, unroll=_FORI_UNROLL)


def _stats_kernel_single(x_ref, o_ref, *, hw):
    # Whole H*W fits in one block: direct reductions, no persistent accumulators, so a
    # large row_block (chosen by the wrapper) is safe and amortizes per-step overhead.
    x = x_ref[...].astype(jnp.float32)                      # (R, HW)
    s = jnp.sum(x, axis=-1, keepdims=True)
    ss = jnp.sum(x * x, axis=-1, keepdims=True)
    mx = jnp.max(x, axis=-1, keepdims=True)
    mn = jnp.min(x, axis=-1, keepdims=True)
    o_ref[...] = _finalize(s, ss, mx, mn, hw, o_ref.dtype)


def _stats_kernel_tiled(x_ref, o_ref, sum_ref, sq_ref, mx_ref, mn_ref, *,
                        hw, hw_chunk, needs_mask):
    k = pl.program_id(1)
    nk = pl.num_programs(1)
    n_slabs = hw_chunk // 128            # hw_chunk is a multiple of 128 by construction
    R = x_ref.shape[0]

    @pl.when(k == 0)
    def _init():
        sum_ref[...] = jnp.zeros_like(sum_ref)
        sq_ref[...] = jnp.zeros_like(sq_ref)
        mx_ref[...] = jnp.full_like(mx_ref, -jnp.inf)
        mn_ref[...] = jnp.full_like(mn_ref, jnp.inf)

    def run(masked):
        # Lane-resident partials held in registers across the slab loop, stored back
        # to VMEM scratch once per grid step.  Pure VPU elementwise in steady state.
        if masked:
            # Hoisted once: JAX doesn't CSE broadcast_in_dim; only a scalar limit
            # changes per slab inside the loop.
            lane = lax.broadcasted_iota(jnp.int32, (R, 128), 1)
            base = k * hw_chunk

        def load(j):
            start = j * 128
            if not isinstance(start, int):
                start = pl.multiple_of(start, 128)
            xs = x_ref[:, pl.ds(start, 128)].astype(jnp.float32)
            if masked:
                limit = hw - base - j * 128          # scalar-unit math
                valid = lane < limit
                return (jnp.where(valid, xs, 0.0),
                        jnp.where(valid, xs, -jnp.inf),
                        jnp.where(valid, xs, jnp.inf))
            return xs, xs, xs

        init = (sum_ref[...], sq_ref[...], mx_ref[...], mn_ref[...])
        s, ss, mx, mn = _accum_slabs(load, n_slabs, init)
        sum_ref[...], sq_ref[...] = s, ss
        mx_ref[...], mn_ref[...] = mx, mn

    if needs_mask:
        # Only the last chunk can contain out-of-range lanes -> mask only there.
        @pl.when(k < nk - 1)
        def _full():
            run(False)

        @pl.when(k == nk - 1)
        def _partial():
            run(True)
    else:
        run(False)

    @pl.when(k == nk - 1)
    def _epilogue():
        # Single cross-lane (XLU) reduction per row block, then one tiny output store.
        s = jnp.sum(sum_ref[...], axis=-1, keepdims=True)
        ss = jnp.sum(sq_ref[...], axis=-1, keepdims=True)
        mx = jnp.max(mx_ref[...], axis=-1, keepdims=True)
        mn = jnp.min(mn_ref[...], axis=-1, keepdims=True)
        o_ref[...] = _finalize(s, ss, mx, mn, hw, o_ref.dtype)


def image_statistics(x, *, row_block=None, hw_chunk=None):
    """x: (N, C, H, W) -> (N, 4*C) = [mean | std | amax | amin] per channel."""
    N, C, H, W = x.shape
    rows, hw = N * C, H * W
    x2 = x.reshape(rows, hw)
    itemsize = x2.dtype.itemsize

    def round_rows(rb):
        rb = max(1, min(rb, rows))
        if rb < rows:
            rb = max(8, (rb // 8) * 8)
        return rb

    def cap_for_megacore(rb):
        # v7x has 2 TensorCores; with >=16 rows keep at least two row blocks so the
        # "parallel" r axis can shard across both cores.  No effect on v5e/v6e.
        if rows >= 16:
            rb = min(rb, max(8, ((rows // 2) // 8) * 8))
        return rb

    use_single = (hw <= _SINGLE_HW_MAX) and (hw_chunk is None or hw_chunk >= hw)

    out_shape = jax.ShapeDtypeStruct((rows, 4), x.dtype)

    if use_single:
        # No register-resident accumulators in this path -> large row_block is safe.
        if row_block is None:
            row_block = _TARGET_BLOCK_BYTES // max(1, hw * itemsize)
            row_block = max(8, min(256, row_block))
        row_block = cap_for_megacore(round_rows(row_block))
        num_r = pl.cdiv(rows, row_block)

        out4 = pl.pallas_call(
            functools.partial(_stats_kernel_single, hw=hw),
            out_shape=out_shape,
            grid_spec=pltpu.PrefetchScalarGridSpec(
                num_scalar_prefetch=0,
                grid=(num_r,),
                in_specs=[pl.BlockSpec((row_block, hw), lambda r: (r, 0))],
                out_specs=pl.BlockSpec((row_block, 4), lambda r: (r, 0)),
            ),
            compiler_params=pltpu.CompilerParams(
                dimension_semantics=("parallel",)),
        )(x2)
    else:
        # Tiled path: 4 x (row_block,128) f32 register accumulators cost row_block/2
        # vregs -> keep row_block <= 64 and grow bytes/step via hw_chunk only.
        if row_block is None:
            row_block = 64
        row_block = cap_for_megacore(round_rows(min(row_block, 64)))
        num_r = pl.cdiv(rows, row_block)

        if hw_chunk is None:
            hw_chunk = _TARGET_BLOCK_BYTES // max(1, row_block * itemsize)
        hw_chunk = min(hw_chunk, hw)
        hw_chunk = max(128, (hw_chunk // 128) * 128)
        num_k = pl.cdiv(hw, hw_chunk)
        needs_mask = (hw % hw_chunk) != 0

        kernel = functools.partial(
            _stats_kernel_tiled, hw=hw, hw_chunk=hw_chunk, needs_mask=needs_mask)
        out4 = pl.pallas_call(
            kernel,
            out_shape=out_shape,
            grid_spec=pltpu.PrefetchScalarGridSpec(
                num_scalar_prefetch=0,
                grid=(num_r, num_k),
                in_specs=[pl.BlockSpec((row_block, hw_chunk), lambda r, k: (r, k))],
                out_specs=pl.BlockSpec((row_block, 4), lambda r, k: (r, 0)),
                scratch_shapes=[pltpu.VMEM((row_block, 128), jnp.float32)
                                for _ in range(4)],
            ),
            compiler_params=pltpu.CompilerParams(
                dimension_semantics=("parallel", "arbitrary")),
        )(x2)

    # (rows, 4) -> (N, 4*C) matching torch.cat([mean, std, amax, amin], dim=1).
    return out4.reshape(N, C, 4).transpose(0, 2, 1).reshape(N, 4 * C)


def _reference(x):
    mean = jnp.mean(x, axis=(2, 3))
    std = jnp.std(x, axis=(2, 3), ddof=1)  # torch.std default: unbiased
    mx = jnp.max(x, axis=(2, 3))
    mn = jnp.min(x, axis=(2, 3))
    return jnp.concatenate([mean, std, mx, mn], axis=1)


if __name__ == "__main__":
    key = jax.random.PRNGKey(0)

    # Shapes implied by the module's forward (NCHW images).
    N, C, H, W = 2, 4, 16, 16
    x = jax.random.normal(key, (N, C, H, W), dtype=jnp.float32)

    out = jax.block_until_ready(image_statistics(x))
    ref = _reference(x)
    assert out.shape == (N, 4 * C), out.shape
    assert jnp.allclose(out, ref, atol=1e-4, rtol=1e-4), (out, ref)

    # Tiled multi-chunk path with a masked remainder chunk (H*W = 169).
    x2 = jax.random.normal(jax.random.PRNGKey(1), (2, 3, 13, 13), dtype=jnp.float32)
    out2 = jax.block_until_ready(image_statistics(x2, hw_chunk=128))
    assert jnp.allclose(out2, _reference(x2), atol=1e-4, rtol=1e-4)

    # Multiple row blocks + multiple full (unmasked) chunks, static slab unroll.
    x3 = jax.random.normal(jax.random.PRNGKey(2), (4, 8, 32, 32), dtype=jnp.float32)
    out3 = jax.block_until_ready(image_statistics(x3, row_block=8, hw_chunk=256))
    assert jnp.allclose(out3, _reference(x3), atol=1e-4, rtol=1e-4)

    # Large H*W -> default big chunk, fori_loop slab loop, masked last chunk.
    x4 = jax.random.normal(jax.random.PRNGKey(3), (1, 2, 100, 100), dtype=jnp.float32)
    out4 = jax.block_until_ready(image_statistics(x4))
    assert jnp.allclose(out4, _reference(x4), atol=1e-3, rtol=1e-3)

    print("KERNEL_OK")
</pallas_src>

<mosaic_0001>
module attributes {stable_mosaic.version = 11 : i64} {
  func.func @_stats_kernel_single(%arg0: i32, %arg1: memref<8x256xf32, #tpu.memory_space<vmem>>, %arg2: memref<8x4xf32, #tpu.memory_space<vmem>>) attributes {dimension_semantics = [#tpu.dimension_semantics<parallel>], iteration_bounds = array<i64: 1>, scalar_prefetch = 0 : i64, scratch_operands = 0 : i64, tpu.core_type = #tpu.core_type<tc>, window_params = [{transform_indices = @transform_0, window_bounds = array<i64: 8, 256>}, {transform_indices = @transform_1, window_bounds = array<i64: 8, 4>}]} {
    %c0 = arith.constant 0 : index
    %c0_0 = arith.constant 0 : index
    %0 = vector.load %arg1[%c0, %c0_0] : memref<8x256xf32, #tpu.memory_space<vmem>>, vector<8x256xf32>
    %cst = arith.constant dense<0.000000e+00> : vector<8xf32>
    %1 = vector.multi_reduction <add>, %0, %cst [1] : vector<8x256xf32> to vector<8xf32>
    %2 = vector.shape_cast %1 : vector<8xf32> to vector<8x1xf32>
    %3 = arith.mulf %0, %0 : vector<8x256xf32>
    %cst_1 = arith.constant dense<0.000000e+00> : vector<8xf32>
    %4 = vector.multi_reduction <add>, %3, %cst_1 [1] : vector<8x256xf32> to vector<8xf32>
    %5 = vector.shape_cast %4 : vector<8xf32> to vector<8x1xf32>
    %cst_2 = arith.constant dense<0xFF800000> : vector<8xf32>
    %6 = vector.multi_reduction <maximumf>, %0, %cst_2 [1] : vector<8x256xf32> to vector<8xf32>
    %7 = vector.shape_cast %6 : vector<8xf32> to vector<8x1xf32>
    %cst_3 = arith.constant dense<0x7F800000> : vector<8xf32>
    %8 = vector.multi_reduction <minimumf>, %0, %cst_3 [1] : vector<8x256xf32> to vector<8xf32>
    %9 = vector.shape_cast %8 : vector<8xf32> to vector<8x1xf32>
    %cst_4 = arith.constant 3.906250e-03 : f32
    %10 = vector.broadcast %cst_4 : f32 to vector<8x1xf32>
    %11 = arith.mulf %2, %10 : vector<8x1xf32>
    %12 = arith.mulf %2, %11 : vector<8x1xf32>
    %13 = arith.subf %5, %12 : vector<8x1xf32>
    %cst_5 = arith.constant 0.00392156886 : f32
    %14 = vector.broadcast %cst_5 : f32 to vector<8x1xf32>
    %15 = arith.mulf %13, %14 : vector<8x1xf32>
    %cst_6 = arith.constant 0.000000e+00 : f32
    %16 = vector.broadcast %cst_6 : f32 to vector<8x1xf32>
    %17 = arith.maximumf %15, %16 : vector<8x1xf32>
    %18 = math.sqrt %17 : vector<8x1xf32>
    %19 = tpu.concatenate %11, %18, %7, %9 in 1 : vector<8x1xf32>, vector<8x1xf32>, vector<8x1xf32>, vector<8x1xf32> -> vector<8x4xf32>
    %c0_7 = arith.constant 0 : index
    %c0_8 = arith.constant 0 : index
    %20 = vector.load %arg2[%c0_7, %c0_8] : memref<8x4xf32, #tpu.memory_space<vmem>>, vector<8x4xf32>
    tpu.vector_store %arg2[%c0_7, %c0_8], %19 {strides = array<i32>} : memref<8x4xf32, #tpu.memory_space<vmem>>, vector<8x4xf32>,
    return
  }
  func.func @transform_0(%arg0: i32) -> (i32, i32) {
    %c0_i32 = arith.constant 0 : i32
    %c0_i32_0 = arith.constant 0 : i32
    return %arg0, %c0_i32 : i32, i32
  }
  func.func @transform_1(%arg0: i32) -> (i32, i32) {
    %c0_i32 = arith.constant 0 : i32
    %c0_i32_0 = arith.constant 0 : i32
    return %arg0, %c0_i32 : i32, i32
  }
}

</mosaic_0001>

<bundles_post_ra>
// kernel: tpu_custom_call.1
= control target key start
LH: loop header
LB: loop body
LE: loop exit
PB: predicated region body
PF: predicated region fallthrough
CT: control target
= control target key end

     0   :  { %6 = vsyncpa [#allocation3], 0  ;;  %s88_s6 = smov [#allocation2]   ;;  %s114_s0 = inlined_call_operand.hbm [shape: f32[8,256], index: 0, kind: input, shape index: {}]   ;;  %s115_s1 = inlined_call_operand.vmem [shape: f32[8,4], index: 1, kind: output, shape index: {}]  }
   0x1   :  { %s13_s7 = sshll.u32 %s88_s6, 4  ;;  %s64_s10 = scalar_lea.hbm %s114_s0, 256  ;;  %s14_s7 = int_to_ptr.vmem [resolvable:$true] %s13_s7 }
   0x2   :  { %p65_p0 = scmp.ne.s32.totalorder %s114_s0, %s64_s10  ;;  %p68_p1 = scmp.lt.u32.totalorder %s64_s10, %s114_s0 }
   0x4   :  { %p70_p2 = pnand %p68_p1, %p65_p0 }
   0x6   :  { %73 = shalt.err (!%p70_p2)
}
   0x7   :  { %s74_s15 = scalar_lea.vmem %s14_s7, 256  ;;  %p79_p4 = scmp.lt.s32.totalorder %s14_s7, %s14_s7 }
   0x8   :  { %p75_p3 = scmp.ne.s32.totalorder %s14_s7, %s74_s15  ;;  %p80_p5 = scmp.lt.s32.totalorder %s74_s15, %s74_s15 }
   0xa   :  { %p81_p6 = por %p80_p5, %p79_p4 }
   0xc   :  { %p82_p7 = pnand %p81_p6, %p75_p3 }
   0xe   :  { %85 = shalt.err (!%p82_p7)
}
   0xf   :  { %16 = dma.hbm_to_vmem [thread:$0]  %s114_s0, 256, %s14_s7, [#allocation3]  }
  0x10   :  { %86 = dma.done.wait [#allocation3], 256  }
  0x11   :  { %87 = vsyncadd [#allocation3], 4294967040  ;;  %v20_v0 = vld [vmem:[#allocation2] sm:$0xff]  ;;  %v21_v1 = vld [vmem:[#allocation2 + $0x8] sm:$0xff]  ;;  %vm48_vm0 = vcmask 7168   ;;  %vm50_vm2 = vcmask 15360  }
  0x12   :  { %v22_v2 = vadd.f32 %v21_v1, %v20_v0  ;;  %v25_v3 = vmul.f32 %v20_v0, %v20_v0  ;;  %v26_v4 = vmul.f32 %v21_v1, %v21_v1  ;;  %v30_v5 = vmax.f32 %v20_v0, %v21_v1 }
  0x13   :  { %v33_v7 = vmin.f32 %v20_v0, %v21_v1  ;;  %vm52_vm4 = vcmask 23552   ;;  %vm54_vm5 = vcmask 31744  }
  0x14   :  { %23 = vadd.xlane.f32.xlu0 %v22_v2  ;;  %v27_v6 = vadd.f32 %v26_v4, %v25_v3  ;;  %31 = vmax.xlane.f32.xlu1 %v30_v5 }
  0x18   :  { %28 = vadd.xlane.f32.xlu0 %v27_v6  ;;  %34 = vmin.xlane.f32.xlu1 %v33_v7 }
  0xa1   :  { %v24_v8 = vpop.xlane.xlu0 %23  ;;  %v32_v15 = vpop.xlane.xlu1 %31 }
  0xa2   :  { %v36_v9 = vmul.f32 0.00390625, %v24_v8 }
  0xa4   :  { %v37_v10 = vmul.f32 %v36_v9, %v24_v8 }
  0xa5   :  { %v29_v11 = vpop.xlane.xlu0 %28  ;;  %v35_v21 = vpop.xlane.xlu1 %34 }
  0xa6   :  { %v38_v12 = vsub.f32 %v29_v11, %v37_v10 }
  0xa8   :  { %v39_v13 = vmul.f32 0.003921569, %v38_v12 }
  0xaa   :  { %v40_v14 = vmax.f32 %v39_v13, 0.0 }
  0xac   :  { %62 = vrsqrt.f32 %v40_v14  ;;  %vm43_vm1 = vcmp.eq.f32.partialorder %v40_v14, inf  ;;  %v46_v18 = vand.u32 2147483648, %v40_v14  ;;  %vm45_vm3 = vcmp.eq.f32.partialorder %v40_v14, 0.0 }
  0xb6   :  { %v63_v16 = vpop.eup %62 }
  0xb7   :  { %v42_v17 = vmul.f32 %v63_v16, %v40_v14 }
  0xb9   :  { %v44_v19 = vsel %vm43_vm1, %v40_v14, %v42_v17 }
  0xba   :  { %v47_v20 = vsel %vm45_vm3, %v46_v18, %v44_v19 }
  0xbb   :  { %v49_v22 = vsel %vm48_vm0, %v36_v9, %v47_v20 }
  0xbc   :  { %v51_v23 = vsel %vm50_vm2, %v49_v22, %v32_v15 }
  0xbd   :  { %v53_v24 = vsel %vm52_vm4, %v51_v23, %v35_v21 }
  0xbe   :  { %55 = vst.msk [vmem:[%s115_s1] sm:$0xff] %vm54_vm5, %v53_v24 }
  0xbf   :  { %60 = vsyncpa [#allocation3], 1 }

</bundles_post_ra>
